<compile_context>
chip_gen: v6e
topology: v6e:2x2x1
jax: 0.10.0
libtpu: 0.0.40
codegen_flags: <defaults>
</compile_context>

<pallas_src>
from functools import partial

import jax
import jax.numpy as jnp
from jax.experimental import pallas as pl
from jax.experimental.pallas import tpu as pltpu

DIM = 32
N_LAYERS = 5
BN_EPS = 1e-5
_PARAMS_PER_LAYER = 6  # w1, b1, w2, b2, bn_scale, bn_shift


# ----------------------------- fused Pallas kernel ---------------------------

def fused_net_kernel(a_ref, x_ref, *rest):
    """Whole network in one kernel; everything is a whole-array VMEM block.

    rest = [w1, b1, w2, b2, scale, shift] * 5  (per GIN layer, BN pre-folded)
           + [pool, wf1, bf1, wf2, bf2]        (head)
           + [out_ref]
    """
    n_layer_refs = N_LAYERS * _PARAMS_PER_LAYER
    layer_refs = rest[:n_layer_refs]
    p_ref, wf1_ref, bf1_ref, wf2_ref, bf2_ref, out_ref = rest[n_layer_refs:]

    a = a_ref[...]                       # (N, N), loaded once, reused 5x
    h = x_ref[...]                       # (N, F) node features

    # 5 x (aggregate -> Linear -> ReLU -> Linear -> ReLU -> folded-BN FMA),
    # fully unrolled; intermediates never leave VMEM/vregs.
    for l in range(N_LAYERS):
        w1, b1, w2, b2, scale, shift = layer_refs[
            l * _PARAMS_PER_LAYER:(l + 1) * _PARAMS_PER_LAYER]
        # GINConv aggregation: (1+eps)*x_i + sum_{j in N(i)} x_j == A_hat @ h
        agg = jnp.dot(a, h, preferred_element_type=jnp.float32)
        # MLP: Linear -> ReLU -> Linear   ((1,32) biases row-broadcast)
        z = jnp.dot(agg, w1[...], preferred_element_type=jnp.float32) + b1[...]
        z = jnp.maximum(z, 0.0)
        z = jnp.dot(z, w2[...], preferred_element_type=jnp.float32) + b2[...]
        # outer F.relu(conv(x))
        z = jnp.maximum(z, 0.0)
        # BatchNorm1d (eval) folded to a single FMA
        h = z * scale[...] + shift[...]

    # global_add_pool: (B, N) @ (N, DIM) -> (B, DIM)
    pooled = jnp.dot(p_ref[...], h, preferred_element_type=jnp.float32)
    # fc1 + ReLU
    y = jnp.dot(pooled, wf1_ref[...], preferred_element_type=jnp.float32) + bf1_ref[...]
    y = jnp.maximum(y, 0.0)
    # dropout(p=0.5, training=False) -> identity
    # fc2
    y = jnp.dot(y, wf2_ref[...], preferred_element_type=jnp.float32) + bf2_ref[...]
    # log_softmax(dim=-1)
    m = jnp.max(y, axis=-1, keepdims=True)
    z = y - m
    out_ref[...] = z - jnp.log(jnp.sum(jnp.exp(z), axis=-1, keepdims=True))


# ------------------------------ JAX wrappers ---------------------------------

def _fused_call(a_hat, x, pool_mat, layer_params, fc_params):
    flat_layers = tuple(p for params in layer_params for p in params)
    inputs = (a_hat, x) + flat_layers + (pool_mat,) + tuple(fc_params)
    n_graphs = pool_mat.shape[0]
    num_classes = fc_params[2].shape[1]
    vmem = pl.BlockSpec(memory_space=pltpu.MemorySpace.VMEM)
    return pl.pallas_call(
        fused_net_kernel,
        out_shape=jax.ShapeDtypeStruct((n_graphs, num_classes), jnp.float32),
        in_specs=[vmem] * len(inputs),
        out_specs=vmem,
    )(*inputs)


@partial(jax.jit, static_argnames=("num_graphs",))
def net_forward(x, edge_index, batch, num_graphs, layer_params, fc_params):
    n_nodes = x.shape[0]
    # Glue (inside jit): dense aggregation / pooling matrices.  Scatter-add
    # has no rectangular-tile Pallas form; the hot matmuls run in the kernel.
    src, dst = edge_index[0], edge_index[1]
    adj = jnp.zeros((n_nodes, n_nodes), jnp.float32).at[dst, src].add(1.0)
    a_hat = adj + jnp.eye(n_nodes, dtype=jnp.float32)                 # eps = 0.0
    pool_mat = jax.nn.one_hot(batch, num_graphs, dtype=jnp.float32).T  # (B, N)
    return _fused_call(a_hat, x, pool_mat, layer_params, fc_params)


# -------------------------------- parameters ---------------------------------

def init_params(key, num_features, num_classes):
    keys = iter(jax.random.split(key, 64))

    def lin(k, fan_in, fan_out):
        scale = 1.0 / jnp.sqrt(jnp.float32(fan_in))
        kw, kb = jax.random.split(k)
        w = jax.random.uniform(kw, (fan_in, fan_out), jnp.float32, -scale, scale)
        b = jax.random.uniform(kb, (1, fan_out), jnp.float32, -scale, scale)
        return w, b

    layer_params = []
    in_dim = num_features
    for _ in range(N_LAYERS):
        w1, b1 = lin(next(keys), in_dim, DIM)
        w2, b2 = lin(next(keys), DIM, DIM)
        gamma = 1.0 + 0.1 * jax.random.normal(next(keys), (1, DIM), jnp.float32)
        beta = 0.1 * jax.random.normal(next(keys), (1, DIM), jnp.float32)
        mean = 0.1 * jax.random.normal(next(keys), (1, DIM), jnp.float32)
        var = jax.random.uniform(next(keys), (1, DIM), jnp.float32, 0.5, 1.5)
        # Fold BN eval stats:  gamma*(h-mean)/sqrt(var+eps)+beta == h*scale+shift
        bn_scale = gamma * jax.lax.rsqrt(var + BN_EPS)
        bn_shift = beta - mean * bn_scale
        layer_params.append((w1, b1, w2, b2, bn_scale, bn_shift))
        in_dim = DIM

    wf1, bf1 = lin(next(keys), DIM, DIM)
    wf2, bf2 = lin(next(keys), DIM, num_classes)
    fc_params = (wf1, bf1, wf2, bf2)
    return tuple(layer_params), fc_params


# ---------------------------------- driver ------------------------------------

if __name__ == "__main__":
    key = jax.random.PRNGKey(0)
    k_x, k_src, k_dst, k_par = jax.random.split(key, 4)

    N_NODES = 32          # total nodes in the mini-batch
    N_EDGES = 96
    N_GRAPHS = 2
    NUM_FEATURES = 16     # dataset.num_features (synthetic)
    NUM_CLASSES = 4       # dataset.num_classes (synthetic)

    x = jax.random.normal(k_x, (N_NODES, NUM_FEATURES), jnp.float32)
    src = jax.random.randint(k_src, (N_EDGES,), 0, N_NODES)
    dst = jax.random.randint(k_dst, (N_EDGES,), 0, N_NODES)
    edge_index = jnp.stack([src, dst]).astype(jnp.int32)               # [2, E]
    batch = (jnp.arange(N_NODES) >= N_NODES // 2).astype(jnp.int32)    # [N]

    layer_params, fc_params = init_params(k_par, NUM_FEATURES, NUM_CLASSES)

    out = net_forward(x, edge_index, batch, N_GRAPHS, layer_params, fc_params)
    out = jax.block_until_ready(out)

    assert out.shape == (N_GRAPHS, NUM_CLASSES)
    # log_softmax rows must exponentiate-and-sum to ~1
    assert jnp.allclose(jnp.sum(jnp.exp(out), axis=-1), 1.0, atol=1e-5)
    print("KERNEL_OK")
</pallas_src>

<mosaic_0001>
module attributes {stable_mosaic.version = 11 : i64} {
  func.func private @main(%arg0: i32) attributes {dimension_semantics = [#tpu.dimension_semantics<core_parallel>], iteration_bounds = array<i64: 2>, tpu.core_type = #tpu.core_type<sc_scalar_subcore>, window_params = []} {
    return
  }
}

module attributes {stable_mosaic.version = 11 : i64} {
  func.func private @main(%arg0: i32) attributes {dimension_semantics = [#tpu.dimension_semantics<core_parallel>], iteration_bounds = array<i64: 2>, tpu.core_type = #tpu.core_type<sc_scalar_subcore>, window_params = []} {
    return
  }
}

module attributes {stable_mosaic.version = 11 : i64} {
  func.func @fused_net_kernel(%arg0: memref<32x32xf32, #tpu.memory_space<vmem>>, %arg1: memref<32x16xf32, #tpu.memory_space<vmem>>, %arg2: memref<16x32xf32, #tpu.memory_space<vmem>>, %arg3: memref<1x32xf32, #tpu.memory_space<vmem>>, %arg4: memref<32x32xf32, #tpu.memory_space<vmem>>, %arg5: memref<1x32xf32, #tpu.memory_space<vmem>>, %arg6: memref<1x32xf32, #tpu.memory_space<vmem>>, %arg7: memref<1x32xf32, #tpu.memory_space<vmem>>, %arg8: memref<32x32xf32, #tpu.memory_space<vmem>>, %arg9: memref<1x32xf32, #tpu.memory_space<vmem>>, %arg10: memref<32x32xf32, #tpu.memory_space<vmem>>, %arg11: memref<1x32xf32, #tpu.memory_space<vmem>>, %arg12: memref<1x32xf32, #tpu.memory_space<vmem>>, %arg13: memref<1x32xf32, #tpu.memory_space<vmem>>, %arg14: memref<32x32xf32, #tpu.memory_space<vmem>>, %arg15: memref<1x32xf32, #tpu.memory_space<vmem>>, %arg16: memref<32x32xf32, #tpu.memory_space<vmem>>, %arg17: memref<1x32xf32, #tpu.memory_space<vmem>>, %arg18: memref<1x32xf32, #tpu.memory_space<vmem>>, %arg19: memref<1x32xf32, #tpu.memory_space<vmem>>, %arg20: memref<32x32xf32, #tpu.memory_space<vmem>>, %arg21: memref<1x32xf32, #tpu.memory_space<vmem>>, %arg22: memref<32x32xf32, #tpu.memory_space<vmem>>, %arg23: memref<1x32xf32, #tpu.memory_space<vmem>>, %arg24: memref<1x32xf32, #tpu.memory_space<vmem>>, %arg25: memref<1x32xf32, #tpu.memory_space<vmem>>, %arg26: memref<32x32xf32, #tpu.memory_space<vmem>>, %arg27: memref<1x32xf32, #tpu.memory_space<vmem>>, %arg28: memref<32x32xf32, #tpu.memory_space<vmem>>, %arg29: memref<1x32xf32, #tpu.memory_space<vmem>>, %arg30: memref<1x32xf32, #tpu.memory_space<vmem>>, %arg31: memref<1x32xf32, #tpu.memory_space<vmem>>, %arg32: memref<2x32xf32, #tpu.memory_space<vmem>>, %arg33: memref<32x32xf32, #tpu.memory_space<vmem>>, %arg34: memref<1x32xf32, #tpu.memory_space<vmem>>, %arg35: memref<32x4xf32, #tpu.memory_space<vmem>>, %arg36: memref<1x4xf32, #tpu.memory_space<vmem>>, %arg37: memref<2x4xf32, #tpu.memory_space<vmem>>) attributes {dimension_semantics = [], scalar_prefetch = 0 : i64, scratch_operands = 0 : i64, tpu.core_type = #tpu.core_type<tc>} {
    %c0 = arith.constant 0 : index
    %c0_0 = arith.constant 0 : index
    %0 = vector.load %arg0[%c0, %c0_0] : memref<32x32xf32, #tpu.memory_space<vmem>>, vector<32x32xf32>
    %c0_1 = arith.constant 0 : index
    %c0_2 = arith.constant 0 : index
    %1 = vector.load %arg1[%c0_1, %c0_2] : memref<32x16xf32, #tpu.memory_space<vmem>>, vector<32x16xf32>
    %cst = arith.constant dense<0.000000e+00> : vector<32x16xf32>
    %2 = tpu.matmul %0, %1, %cst {dimension_numbers = #tpu.dot_dimension_numbers<[1], [0], [0], [1], [0, 0, 1, 1], [], []>} : vector<32x32xf32>, vector<32x16xf32>, vector<32x16xf32> -> vector<32x16xf32>
    %c0_3 = arith.constant 0 : index
    %c0_4 = arith.constant 0 : index
    %3 = vector.load %arg2[%c0_3, %c0_4] : memref<16x32xf32, #tpu.memory_space<vmem>>, vector<16x32xf32>
    %cst_5 = arith.constant dense<0.000000e+00> : vector<32x32xf32>
    %4 = tpu.matmul %2, %3, %cst_5 {dimension_numbers = #tpu.dot_dimension_numbers<[1], [0], [0], [1], [0, 0, 1, 1], [], []>} : vector<32x16xf32>, vector<16x32xf32>, vector<32x32xf32> -> vector<32x32xf32>
    %c0_6 = arith.constant 0 : index
    %c0_7 = arith.constant 0 : index
    %5 = vector.load %arg3[%c0_6, %c0_7] : memref<1x32xf32, #tpu.memory_space<vmem>>, vector<1x32xf32>
    %6 = vector.broadcast %5 : vector<1x32xf32> to vector<32x32xf32>
    %7 = arith.addf %4, %6 : vector<32x32xf32>
    %cst_8 = arith.constant 0.000000e+00 : f32
    %8 = vector.broadcast %cst_8 : f32 to vector<32x32xf32>
    %9 = arith.maximumf %7, %8 : vector<32x32xf32>
    %c0_9 = arith.constant 0 : index
    %c0_10 = arith.constant 0 : index
    %10 = vector.load %arg4[%c0_9, %c0_10] : memref<32x32xf32, #tpu.memory_space<vmem>>, vector<32x32xf32>
    %cst_11 = arith.constant dense<0.000000e+00> : vector<32x32xf32>
    %11 = tpu.matmul %9, %10, %cst_11 {dimension_numbers = #tpu.dot_dimension_numbers<[1], [0], [0], [1], [0, 0, 1, 1], [], []>} : vector<32x32xf32>, vector<32x32xf32>, vector<32x32xf32> -> vector<32x32xf32>
    %c0_12 = arith.constant 0 : index
    %c0_13 = arith.constant 0 : index
    %12 = vector.load %arg5[%c0_12, %c0_13] : memref<1x32xf32, #tpu.memory_space<vmem>>, vector<1x32xf32>
    %13 = vector.broadcast %12 : vector<1x32xf32> to vector<32x32xf32>
    %14 = arith.addf %11, %13 : vector<32x32xf32>
    %cst_14 = arith.constant 0.000000e+00 : f32
    %15 = vector.broadcast %cst_14 : f32 to vector<32x32xf32>
    %16 = arith.maximumf %14, %15 : vector<32x32xf32>
    %c0_15 = arith.constant 0 : index
    %c0_16 = arith.constant 0 : index
    %17 = vector.load %arg6[%c0_15, %c0_16] : memref<1x32xf32, #tpu.memory_space<vmem>>, vector<1x32xf32>
    %18 = vector.broadcast %17 : vector<1x32xf32> to vector<32x32xf32>
    %19 = arith.mulf %16, %18 : vector<32x32xf32>
    %c0_17 = arith.constant 0 : index
    %c0_18 = arith.constant 0 : index
    %20 = vector.load %arg7[%c0_17, %c0_18] : memref<1x32xf32, #tpu.memory_space<vmem>>, vector<1x32xf32>
    %21 = vector.broadcast %20 : vector<1x32xf32> to vector<32x32xf32>
    %22 = arith.addf %19, %21 : vector<32x32xf32>
    %cst_19 = arith.constant dense<0.000000e+00> : vector<32x32xf32>
    %23 = tpu.matmul %0, %22, %cst_19 {dimension_numbers = #tpu.dot_dimension_numbers<[1], [0], [0], [1], [0, 0, 1, 1], [], []>} : vector<32x32xf32>, vector<32x32xf32>, vector<32x32xf32> -> vector<32x32xf32>
    %c0_20 = arith.constant 0 : index
    %c0_21 = arith.constant 0 : index
    %24 = vector.load %arg8[%c0_20, %c0_21] : memref<32x32xf32, #tpu.memory_space<vmem>>, vector<32x32xf32>
    %cst_22 = arith.constant dense<0.000000e+00> : vector<32x32xf32>
    %25 = tpu.matmul %23, %24, %cst_22 {dimension_numbers = #tpu.dot_dimension_numbers<[1], [0], [0], [1], [0, 0, 1, 1], [], []>} : vector<32x32xf32>, vector<32x32xf32>, vector<32x32xf32> -> vector<32x32xf32>
    %c0_23 = arith.constant 0 : index
    %c0_24 = arith.constant 0 : index
    %26 = vector.load %arg9[%c0_23, %c0_24] : memref<1x32xf32, #tpu.memory_space<vmem>>, vector<1x32xf32>
    %27 = vector.broadcast %26 : vector<1x32xf32> to vector<32x32xf32>
    %28 = arith.addf %25, %27 : vector<32x32xf32>
    %cst_25 = arith.constant 0.000000e+00 : f32
    %29 = vector.broadcast %cst_25 : f32 to vector<32x32xf32>
    %30 = arith.maximumf %28, %29 : vector<32x32xf32>
    %c0_26 = arith.constant 0 : index
    %c0_27 = arith.constant 0 : index
    %31 = vector.load %arg10[%c0_26, %c0_27] : memref<32x32xf32, #tpu.memory_space<vmem>>, vector<32x32xf32>
    %cst_28 = arith.constant dense<0.000000e+00> : vector<32x32xf32>
    %32 = tpu.matmul %30, %31, %cst_28 {dimension_numbers = #tpu.dot_dimension_numbers<[1], [0], [0], [1], [0, 0, 1, 1], [], []>} : vector<32x32xf32>, vector<32x32xf32>, vector<32x32xf32> -> vector<32x32xf32>
    %c0_29 = arith.constant 0 : index
    %c0_30 = arith.constant 0 : index
    %33 = vector.load %arg11[%c0_29, %c0_30] : memref<1x32xf32, #tpu.memory_space<vmem>>, vector<1x32xf32>
    %34 = vector.broadcast %33 : vector<1x32xf32> to vector<32x32xf32>
    %35 = arith.addf %32, %34 : vector<32x32xf32>
    %cst_31 = arith.constant 0.000000e+00 : f32
    %36 = vector.broadcast %cst_31 : f32 to vector<32x32xf32>
    %37 = arith.maximumf %35, %36 : vector<32x32xf32>
    %c0_32 = arith.constant 0 : index
    %c0_33 = arith.constant 0 : index
    %38 = vector.load %arg12[%c0_32, %c0_33] : memref<1x32xf32, #tpu.memory_space<vmem>>, vector<1x32xf32>
    %39 = vector.broadcast %38 : vector<1x32xf32> to vector<32x32xf32>
    %40 = arith.mulf %37, %39 : vector<32x32xf32>
    %c0_34 = arith.constant 0 : index
    %c0_35 = arith.constant 0 : index
    %41 = vector.load %arg13[%c0_34, %c0_35] : memref<1x32xf32, #tpu.memory_space<vmem>>, vector<1x32xf32>
    %42 = vector.broadcast %41 : vector<1x32xf32> to vector<32x32xf32>
    %43 = arith.addf %40, %42 : vector<32x32xf32>
    %cst_36 = arith.constant dense<0.000000e+00> : vector<32x32xf32>
    %44 = tpu.matmul %0, %43, %cst_36 {dimension_numbers = #tpu.dot_dimension_numbers<[1], [0], [0], [1], [0, 0, 1, 1], [], []>} : vector<32x32xf32>, vector<32x32xf32>, vector<32x32xf32> -> vector<32x32xf32>
    %c0_37 = arith.constant 0 : index
    %c0_38 = arith.constant 0 : index
    %45 = vector.load %arg14[%c0_37, %c0_38] : memref<32x32xf32, #tpu.memory_space<vmem>>, vector<32x32xf32>
    %cst_39 = arith.constant dense<0.000000e+00> : vector<32x32xf32>
    %46 = tpu.matmul %44, %45, %cst_39 {dimension_numbers = #tpu.dot_dimension_numbers<[1], [0], [0], [1], [0, 0, 1, 1], [], []>} : vector<32x32xf32>, vector<32x32xf32>, vector<32x32xf32> -> vector<32x32xf32>
    %c0_40 = arith.constant 0 : index
    %c0_41 = arith.constant 0 : index
    %47 = vector.load %arg15[%c0_40, %c0_41] : memref<1x32xf32, #tpu.memory_space<vmem>>, vector<1x32xf32>
    %48 = vector.broadcast %47 : vector<1x32xf32> to vector<32x32xf32>
    %49 = arith.addf %46, %48 : vector<32x32xf32>
    %cst_42 = arith.constant 0.000000e+00 : f32
    %50 = vector.broadcast %cst_42 : f32 to vector<32x32xf32>
    %51 = arith.maximumf %49, %50 : vector<32x32xf32>
    %c0_43 = arith.constant 0 : index
    %c0_44 = arith.constant 0 : index
    %52 = vector.load %arg16[%c0_43, %c0_44] : memref<32x32xf32, #tpu.memory_space<vmem>>, vector<32x32xf32>
    %cst_45 = arith.constant dense<0.000000e+00> : vector<32x32xf32>
    %53 = tpu.matmul %51, %52, %cst_45 {dimension_numbers = #tpu.dot_dimension_numbers<[1], [0], [0], [1], [0, 0, 1, 1], [], []>} : vector<32x32xf32>, vector<32x32xf32>, vector<32x32xf32> -> vector<32x32xf32>
    %c0_46 = arith.constant 0 : index
    %c0_47 = arith.constant 0 : index
    %54 = vector.load %arg17[%c0_46, %c0_47] : memref<1x32xf32, #tpu.memory_space<vmem>>, vector<1x32xf32>
    %55 = vector.broadcast %54 : vector<1x32xf32> to vector<32x32xf32>
    %56 = arith.addf %53, %55 : vector<32x32xf32>
    %cst_48 = arith.constant 0.000000e+00 : f32
    %57 = vector.broadcast %cst_48 : f32 to vector<32x32xf32>
    %58 = arith.maximumf %56, %57 : vector<32x32xf32>
    %c0_49 = arith.constant 0 : index
    %c0_50 = arith.constant 0 : index
    %59 = vector.load %arg18[%c0_49, %c0_50] : memref<1x32xf32, #tpu.memory_space<vmem>>, vector<1x32xf32>
    %60 = vector.broadcast %59 : vector<1x32xf32> to vector<32x32xf32>
    %61 = arith.mulf %58, %60 : vector<32x32xf32>
    %c0_51 = arith.constant 0 : index
    %c0_52 = arith.constant 0 : index
    %62 = vector.load %arg19[%c0_51, %c0_52] : memref<1x32xf32, #tpu.memory_space<vmem>>, vector<1x32xf32>
    %63 = vector.broadcast %62 : vector<1x32xf32> to vector<32x32xf32>
    %64 = arith.addf %61, %63 : vector<32x32xf32>
    %cst_53 = arith.constant dense<0.000000e+00> : vector<32x32xf32>
    %65 = tpu.matmul %0, %64, %cst_53 {dimension_numbers = #tpu.dot_dimension_numbers<[1], [0], [0], [1], [0, 0, 1, 1], [], []>} : vector<32x32xf32>, vector<32x32xf32>, vector<32x32xf32> -> vector<32x32xf32>
    %c0_54 = arith.constant 0 : index
    %c0_55 = arith.constant 0 : index
    %66 = vector.load %arg20[%c0_54, %c0_55] : memref<32x32xf32, #tpu.memory_space<vmem>>, vector<32x32xf32>
    %cst_56 = arith.constant dense<0.000000e+00> : vector<32x32xf32>
    %67 = tpu.matmul %65, %66, %cst_56 {dimension_numbers = #tpu.dot_dimension_numbers<[1], [0], [0], [1], [0, 0, 1, 1], [], []>} : vector<32x32xf32>, vector<32x32xf32>, vector<32x32xf32> -> vector<32x32xf32>
    %c0_57 = arith.constant 0 : index
    %c0_58 = arith.constant 0 : index
    %68 = vector.load %arg21[%c0_57, %c0_58] : memref<1x32xf32, #tpu.memory_space<vmem>>, vector<1x32xf32>
    %69 = vector.broadcast %68 : vector<1x32xf32> to vector<32x32xf32>
    %70 = arith.addf %67, %69 : vector<32x32xf32>
    %cst_59 = arith.constant 0.000000e+00 : f32
    %71 = vector.broadcast %cst_59 : f32 to vector<32x32xf32>
    %72 = arith.maximumf %70, %71 : vector<32x32xf32>
    %c0_60 = arith.constant 0 : index
    %c0_61 = arith.constant 0 : index
    %73 = vector.load %arg22[%c0_60, %c0_61] : memref<32x32xf32, #tpu.memory_space<vmem>>, vector<32x32xf32>
    %cst_62 = arith.constant dense<0.000000e+00> : vector<32x32xf32>
    %74 = tpu.matmul %72, %73, %cst_62 {dimension_numbers = #tpu.dot_dimension_numbers<[1], [0], [0], [1], [0, 0, 1, 1], [], []>} : vector<32x32xf32>, vector<32x32xf32>, vector<32x32xf32> -> vector<32x32xf32>
    %c0_63 = arith.constant 0 : index
    %c0_64 = arith.constant 0 : index
    %75 = vector.load %arg23[%c0_63, %c0_64] : memref<1x32xf32, #tpu.memory_space<vmem>>, vector<1x32xf32>
    %76 = vector.broadcast %75 : vector<1x32xf32> to vector<32x32xf32>
    %77 = arith.addf %74, %76 : vector<32x32xf32>
    %cst_65 = arith.constant 0.000000e+00 : f32
    %78 = vector.broadcast %cst_65 : f32 to vector<32x32xf32>
    %79 = arith.maximumf %77, %78 : vector<32x32xf32>
    %c0_66 = arith.constant 0 : index
    %c0_67 = arith.constant 0 : index
    %80 = vector.load %arg24[%c0_66, %c0_67] : memref<1x32xf32, #tpu.memory_space<vmem>>, vector<1x32xf32>
    %81 = vector.broadcast %80 : vector<1x32xf32> to vector<32x32xf32>
    %82 = arith.mulf %79, %81 : vector<32x32xf32>
    %c0_68 = arith.constant 0 : index
    %c0_69 = arith.constant 0 : index
    %83 = vector.load %arg25[%c0_68, %c0_69] : memref<1x32xf32, #tpu.memory_space<vmem>>, vector<1x32xf32>
    %84 = vector.broadcast %83 : vector<1x32xf32> to vector<32x32xf32>
    %85 = arith.addf %82, %84 : vector<32x32xf32>
    %cst_70 = arith.constant dense<0.000000e+00> : vector<32x32xf32>
    %86 = tpu.matmul %0, %85, %cst_70 {dimension_numbers = #tpu.dot_dimension_numbers<[1], [0], [0], [1], [0, 0, 1, 1], [], []>} : vector<32x32xf32>, vector<32x32xf32>, vector<32x32xf32> -> vector<32x32xf32>
    %c0_71 = arith.constant 0 : index
    %c0_72 = arith.constant 0 : index
    %87 = vector.load %arg26[%c0_71, %c0_72] : memref<32x32xf32, #tpu.memory_space<vmem>>, vector<32x32xf32>
    %cst_73 = arith.constant dense<0.000000e+00> : vector<32x32xf32>
    %88 = tpu.matmul %86, %87, %cst_73 {dimension_numbers = #tpu.dot_dimension_numbers<[1], [0], [0], [1], [0, 0, 1, 1], [], []>} : vector<32x32xf32>, vector<32x32xf32>, vector<32x32xf32> -> vector<32x32xf32>
    %c0_74 = arith.constant 0 : index
    %c0_75 = arith.constant 0 : index
    %89 = vector.load %arg27[%c0_74, %c0_75] : memref<1x32xf32, #tpu.memory_space<vmem>>, vector<1x32xf32>
    %90 = vector.broadcast %89 : vector<1x32xf32> to vector<32x32xf32>
    %91 = arith.addf %88, %90 : vector<32x32xf32>
    %cst_76 = arith.constant 0.000000e+00 : f32
    %92 = vector.broadcast %cst_76 : f32 to vector<32x32xf32>
    %93 = arith.maximumf %91, %92 : vector<32x32xf32>
    %c0_77 = arith.constant 0 : index
    %c0_78 = arith.constant 0 : index
    %94 = vector.load %arg28[%c0_77, %c0_78] : memref<32x32xf32, #tpu.memory_space<vmem>>, vector<32x32xf32>
    %cst_79 = arith.constant dense<0.000000e+00> : vector<32x32xf32>
    %95 = tpu.matmul %93, %94, %cst_79 {dimension_numbers = #tpu.dot_dimension_numbers<[1], [0], [0], [1], [0, 0, 1, 1], [], []>} : vector<32x32xf32>, vector<32x32xf32>, vector<32x32xf32> -> vector<32x32xf32>
    %c0_80 = arith.constant 0 : index
    %c0_81 = arith.constant 0 : index
    %96 = vector.load %arg29[%c0_80, %c0_81] : memref<1x32xf32, #tpu.memory_space<vmem>>, vector<1x32xf32>
    %97 = vector.broadcast %96 : vector<1x32xf32> to vector<32x32xf32>
    %98 = arith.addf %95, %97 : vector<32x32xf32>
    %cst_82 = arith.constant 0.000000e+00 : f32
    %99 = vector.broadcast %cst_82 : f32 to vector<32x32xf32>
    %100 = arith.maximumf %98, %99 : vector<32x32xf32>
    %c0_83 = arith.constant 0 : index
    %c0_84 = arith.constant 0 : index
    %101 = vector.load %arg30[%c0_83, %c0_84] : memref<1x32xf32, #tpu.memory_space<vmem>>, vector<1x32xf32>
    %102 = vector.broadcast %101 : vector<1x32xf32> to vector<32x32xf32>
    %103 = arith.mulf %100, %102 : vector<32x32xf32>
    %c0_85 = arith.constant 0 : index
    %c0_86 = arith.constant 0 : index
    %104 = vector.load %arg31[%c0_85, %c0_86] : memref<1x32xf32, #tpu.memory_space<vmem>>, vector<1x32xf32>
    %105 = vector.broadcast %104 : vector<1x32xf32> to vector<32x32xf32>
    %106 = arith.addf %103, %105 : vector<32x32xf32>
    %c0_87 = arith.constant 0 : index
    %c0_88 = arith.constant 0 : index
    %107 = vector.load %arg32[%c0_87, %c0_88] : memref<2x32xf32, #tpu.memory_space<vmem>>, vector<2x32xf32>
    %cst_89 = arith.constant dense<0.000000e+00> : vector<2x32xf32>
    %108 = tpu.matmul %107, %106, %cst_89 {dimension_numbers = #tpu.dot_dimension_numbers<[1], [0], [0], [1], [0, 0, 1, 1], [], []>} : vector<2x32xf32>, vector<32x32xf32>, vector<2x32xf32> -> vector<2x32xf32>
    %c0_90 = arith.constant 0 : index
    %c0_91 = arith.constant 0 : index
    %109 = vector.load %arg33[%c0_90, %c0_91] : memref<32x32xf32, #tpu.memory_space<vmem>>, vector<32x32xf32>
    %cst_92 = arith.constant dense<0.000000e+00> : vector<2x32xf32>
    %110 = tpu.matmul %108, %109, %cst_92 {dimension_numbers = #tpu.dot_dimension_numbers<[1], [0], [0], [1], [0, 0, 1, 1], [], []>} : vector<2x32xf32>, vector<32x32xf32>, vector<2x32xf32> -> vector<2x32xf32>
    %c0_93 = arith.constant 0 : index
    %c0_94 = arith.constant 0 : index
    %111 = vector.load %arg34[%c0_93, %c0_94] : memref<1x32xf32, #tpu.memory_space<vmem>>, vector<1x32xf32>
    %112 = vector.broadcast %111 : vector<1x32xf32> to vector<2x32xf32>
    %113 = arith.addf %110, %112 : vector<2x32xf32>
    %cst_95 = arith.constant 0.000000e+00 : f32
    %114 = vector.broadcast %cst_95 : f32 to vector<2x32xf32>
    %115 = arith.maximumf %113, %114 : vector<2x32xf32>
    %c0_96 = arith.constant 0 : index
    %c0_97 = arith.constant 0 : index
    %116 = vector.load %arg35[%c0_96, %c0_97] : memref<32x4xf32, #tpu.memory_space<vmem>>, vector<32x4xf32>
    %cst_98 = arith.constant dense<0.000000e+00> : vector<2x4xf32>
    %117 = tpu.matmul %115, %116, %cst_98 {dimension_numbers = #tpu.dot_dimension_numbers<[1], [0], [0], [1], [0, 0, 1, 1], [], []>} : vector<2x32xf32>, vector<32x4xf32>, vector<2x4xf32> -> vector<2x4xf32>
    %c0_99 = arith.constant 0 : index
    %c0_100 = arith.constant 0 : index
    %118 = vector.load %arg36[%c0_99, %c0_100] : memref<1x4xf32, #tpu.memory_space<vmem>>, vector<1x4xf32>
    %119 = vector.broadcast %118 : vector<1x4xf32> to vector<2x4xf32>
    %120 = arith.addf %117, %119 : vector<2x4xf32>
    %cst_101 = arith.constant dense<0xFF800000> : vector<2xf32>
    %121 = vector.multi_reduction <maximumf>, %120, %cst_101 [1] : vector<2x4xf32> to vector<2xf32>
    %122 = vector.shape_cast %121 : vector<2xf32> to vector<2x1xf32>
    %123 = vector.broadcast %122 : vector<2x1xf32> to vector<2x4xf32>
    %124 = arith.subf %120, %123 : vector<2x4xf32>
    %125 = math.exp %124 : vector<2x4xf32>
    %cst_102 = arith.constant dense<0.000000e+00> : vector<2xf32>
    %126 = vector.multi_reduction <add>, %125, %cst_102 [1] : vector<2x4xf32> to vector<2xf32>
    %127 = vector.shape_cast %126 : vector<2xf32> to vector<2x1xf32>
    %128 = math.log %127 : vector<2x1xf32>
    %129 = vector.broadcast %128 : vector<2x1xf32> to vector<2x4xf32>
    %130 = arith.subf %124, %129 : vector<2x4xf32>
    %c0_103 = arith.constant 0 : index
    %c0_104 = arith.constant 0 : index
    %131 = vector.load %arg37[%c0_103, %c0_104] : memref<2x4xf32, #tpu.memory_space<vmem>>, vector<2x4xf32>
    tpu.vector_store %arg37[%c0_103, %c0_104], %130 {strides = array<i32>} : memref<2x4xf32, #tpu.memory_space<vmem>>, vector<2x4xf32>,
    return
  }
}

</mosaic_0001>

<bundles_post_ra>
// kernel: net_forward.1
= control target key start
LH: loop header
LB: loop body
LE: loop exit
PB: predicated region body
PF: predicated region fallthrough
CT: control target
= control target key end

     0   :  { %s2701_s6 = smov 1   ;;  %s2702_s10 = smov 2   ;;  %s3107_s0 = inlined_call_operand.smem [shape: u32[38], index: -1, kind: input, shape index: {}] }
   0x1   :  { %s2752_s5 = sld [smem:[%s3107_s0]]   ;;  %s2703_s14 = smov 3  }
   0x2   :  { %s2757_s9 = sld [smem:[%s3107_s0 + %s2701_s6]]   ;;  %s2704_s18 = smov 4  }
   0x3   :  { %s2762_s13 = sld [smem:[%s3107_s0 + %s2702_s10]]   ;;  %s2705_s22 = smov 5  }
   0x4   :  { %s2767_s17 = sld [smem:[%s3107_s0 + %s2703_s14]]   ;;  %s2706_s26 = smov 6  }
   0x5   :  { %s2772_s21 = sld [smem:[%s3107_s0 + %s2704_s18]]   ;;  %s2707_s30 = smov 7  }
   0x6   :  { %s2777_s25 = sld [smem:[%s3107_s0 + %s2705_s22]]   ;;  %s2708_s4 = smov 8  }
   0x7   :  { %s2782_s29 = sld [smem:[%s3107_s0 + %s2706_s26]]   ;;  %s2709_s10 = smov 9  }
   0x8   :  { %s2787_s3 = sld [smem:[%s3107_s0 + %s2707_s30]]   ;;  %s2710_s15 = smov 10  }
   0x9   :  { %s2792_s8 = sld [smem:[%s3107_s0 + %s2708_s4]]   ;;  %s2711_s20 = smov 11  }
   0xa   :  { %s2797_s14 = sld [smem:[%s3107_s0 + %s2709_s10]]   ;;  %s2712_s26 = smov 12  }
   0xb   :  { %s2802_s19 = sld [smem:[%s3107_s0 + %s2710_s15]]   ;;  %s2713_s1 = smov 13  }
   0xc   :  { %s2807_s24 = sld [smem:[%s3107_s0 + %s2711_s20]]   ;;  %s2714_s7 = smov 14  }
   0xd   :  { %s2812_s30 = sld [smem:[%s3107_s0 + %s2712_s26]]   ;;  %s2715_s15 = smov 15  }
   0xe   :  { %s2817_s6 = sld [smem:[%s3107_s0 + %s2713_s1]]   ;;  %s2716_s22 = smov 16  }
   0xf   :  { %s2822_s12 = sld [smem:[%s3107_s0 + %s2714_s7]]   ;;  %s2717_s28 = smov 17  }
  0x10   :  { %s2827_s20 = sld [smem:[%s3107_s0 + %s2715_s15]]   ;;  %s2718_s7 = smov 18  }
  0x11   :  { %s2832_s27 = sld [smem:[%s3107_s0 + %s2716_s22]]   ;;  %s2719_s15 = smov 19  }
  0x12   :  { %s2837_s4 = sld [smem:[%s3107_s0 + %s2717_s28]]   ;;  %s2720_s22 = smov 20  }
  0x13   :  { %s2721_s28 = smov 21  }
  0x14   :  { %3114 = sst [smem:[#allocation8_spill]] %s2817_s6 }
  0x15   :  { %s2842_s6 = sld [smem:[%s3107_s0 + %s2718_s7]]   ;;  %s2722_s7 = smov 22  }
  0x16   :  { %3115 = sst [smem:[#allocation9_spill]] %s2827_s20 }
  0x17   :  { %3116 = sst [smem:[#allocation10_spill]] %s2832_s27 }
  0x18   :  { %3117 = sst [smem:[#allocation11_spill]] %s2837_s4 }
  0x19   :  { %s2847_s20 = sld [smem:[%s3107_s0 + %s2719_s15]]   ;;  %s2723_s15 = smov 23  }
  0x1a   :  { %s2852_s27 = sld [smem:[%s3107_s0 + %s2720_s22]]   ;;  %s2724_s22 = smov 24  }
  0x1b   :  { %3118 = sst [smem:[#allocation12_spill]] %s2842_s6 }
  0x1c   :  { %s2857_s4 = sld [smem:[%s3107_s0 + %s2721_s28]]   ;;  %s2725_s28 = smov 25  }
  0x1d   :  { %s2862_s6 = sld [smem:[%s3107_s0 + %s2722_s7]]   ;;  %s2726_s7 = smov 26  }
  0x1f   :  { %3119 = sst [smem:[#allocation13_spill]] %s2847_s20 }
  0x20   :  { %3120 = sst [smem:[#allocation14_spill]] %s2852_s27 }
  0x21   :  { %s2867_s20 = sld [smem:[%s3107_s0 + %s2723_s15]]   ;;  %s2727_s15 = smov 27  }
  0x22   :  { %3121 = sst [smem:[#allocation15_spill]] %s2857_s4 }
  0x23   :  { %3122 = sst [smem:[#allocation16_spill]] %s2862_s6 }
  0x24   :  { %s2872_s27 = sld [smem:[%s3107_s0 + %s2724_s22]]   ;;  %s2728_s22 = smov 28  }
  0x25   :  { %s2877_s4 = sld [smem:[%s3107_s0 + %s2725_s28]]   ;;  %s2729_s28 = smov 29  }
  0x26   :  { %s2882_s6 = sld [smem:[%s3107_s0 + %s2726_s7]]   ;;  %s2730_s7 = smov 30  }
  0x27   :  { %3123 = sst [smem:[#allocation17_spill]] %s2867_s20 }
  0x28   :  { %s2887_s20 = sld [smem:[%s3107_s0 + %s2727_s15]]   ;;  %s2731_s15 = smov 31  }
  0x2a   :  { %3124 = sst [smem:[#allocation18_spill]] %s2872_s27 }
  0x2b   :  { %3125 = sst [smem:[#allocation19_spill]] %s2877_s4 }
  0x2c   :  { %3126 = sst [smem:[#allocation20_spill]] %s2882_s6 }
  0x2d   :  { %s2892_s27 = sld [smem:[%s3107_s0 + %s2728_s22]]   ;;  %s2732_s22 = smov 32  }
  0x2e   :  { %3127 = sst [smem:[#allocation21_spill]] %s2887_s20 }
  0x2f   :  { %s2897_s4 = sld [smem:[%s3107_s0 + %s2729_s28]]   ;;  %s2733_s28 = smov 33  }
  0x30   :  { %s2902_s6 = sld [smem:[%s3107_s0 + %s2730_s7]]   ;;  %s2734_s7 = smov 34  }
  0x31   :  { %s2907_s20 = sld [smem:[%s3107_s0 + %s2731_s15]]   ;;  %s2735_s15 = smov 35  }
  0x33   :  { %3128 = sst [smem:[#allocation22_spill]] %s2892_s27 }
  0x34   :  { %s2912_s27 = sld [smem:[%s3107_s0 + %s2732_s22]]   ;;  %s2736_s22 = smov 36  }
  0x35   :  { %3129 = sst [smem:[#allocation23_spill]] %s2897_s4 }
  0x36   :  { %3130 = sst [smem:[#allocation24_spill]] %s2902_s6 }
  0x37   :  { %3131 = sst [smem:[#allocation25_spill]] %s2907_s20 }
  0x38   :  { %s2917_s4 = sld [smem:[%s3107_s0 + %s2733_s28]]   ;;  %s2737_s28 = smov 37  }
  0x39   :  { %s2922_s6 = sld [smem:[%s3107_s0 + %s2734_s7]]  }
  0x3a   :  { %3132 = sst [smem:[#allocation26_spill]] %s2912_s27 }
  0x3b   :  { %s2927_s20 = sld [smem:[%s3107_s0 + %s2735_s15]]  }
  0x3c   :  { %s2932_s27 = sld [smem:[%s3107_s0 + %s2736_s22]]  }
  0x3e   :  { %3133 = sst [smem:[#allocation27_spill]] %s2917_s4 }
  0x3f   :  { %s2937_s4 = sld [smem:[%s3107_s0 + %s2737_s28]]  }
  0x40   :  { %80 = vsyncpa [#allocation3], 0 }
  0x41   :  { %81 = vsyncpa [#allocation4], 0  ;;  %s2738_s7 = smov [#allocation2]  }
  0x42   :  { %s87_s10 = sshll.u32 %s2738_s7, 4  ;;  %s88_s10 = int_to_ptr.vmem [resolvable:$true] %s87_s10 }
  0x43   :  { %s2665_s11 = scalar_lea.vmem %s88_s10, 512  ;;  %p2670_p1 = scmp.lt.s32.totalorder %s88_s10, %s88_s10 }
  0x44   :  { %p2666_p0 = scmp.ne.s32.totalorder %s88_s10, %s2665_s11  ;;  %p2671_p2 = scmp.lt.s32.totalorder %s2665_s11, %s2665_s11 }
  0x46   :  { %p2672_p3 = por %p2671_p2, %p2670_p1 }
  0x48   :  { %p2673_p4 = pnand %p2672_p3, %p2666_p0 }
  0x4a   :  { %2676 = shalt.err (!%p2673_p4)
}
  0x4b   :  { %s2739_s15 = smov 128   ;;  %s2740_s16 = smov 8  }
  0x4c   :  { %93 = dma.hbm_to_vmem [thread:$0]  %s2752_s5, 512, %s88_s10, [#allocation3], %s2739_s15, %s2739_s15, %s2740_s16  }
  0x4d   :  { %2697 = dma.done.wait [#allocation3], 512  }
  0x4e   :  { %2698 = vsyncadd [#allocation3], 4294966784  ;;  %vm177_vm0 = vcmask 261120   ;;  %v176_v0 = vld [vmem:[%s2757_s9 + $0x18] sm:$0xff]  ;;  %v175_v1 = vld [vmem:[%s2757_s9 + $0x10] sm:$0xff]  ;;  %vm284_vm1 = vcmask 130048  }
  0x4f   :  { %2371 = vmatprep.subr.mxu0 %v176_v0  ;;  %v2942_v2 = vld [vmem:[#allocation2] sm:$0xff]  ;;  %v174_v3 = vld [vmem:[%s2757_s9 + $0x8] sm:$0xff]  ;;  %v2950_v6 = vld [vmem:[#allocation2 + $0x10] sm:$0xff]  ;;  %s3134_s0 = sld [smem:[#allocation8_spill]]  ;;  %vm2742_vm2 = vmmov 0   ;;  %vm2087_vm3 = vcmask 25600  }
  0x50   :  { %2372 = vmatpush3.msra.mxu0 %v176_v0  ;;  %2379 = vmatprep.mubr.msk.f32.mxu0 %vm177_vm0, %v2942_v2  ;;  %v173_v4 = vld [vmem:[%s2757_s9] sm:$0xff]  ;;  %v2948_v5 = vld [vmem:[#allocation2 + $0x8] sm:$0xff]  ;;  %v2956_v7 = vld [vmem:[#allocation2 + $0x18] sm:$0xff]  ;;  %s3135_s5 = sld [smem:[#allocation10_spill]] }
  0x51   :  { %2373 = vmatprep.subr.mxu0 %v175_v1  ;;  %v276_v8 = vld [vmem:[%s2762_s13 + $0x8] sm:$0xff]  ;;  %v275_v9 = vld [vmem:[%s2762_s13] sm:$0xff]  ;;  %v389_v14 = vld [vmem:[%s2772_s21 + $0x18] sm:$0xff]  ;;  %s3136_s9 = sld [smem:[#allocation9_spill]] }
  0x52   :  { %2374 = vmatpush3.msra.mxu0 %v175_v1  ;;  %2385 = vmatprep.subr.mxu1 %v276_v8  ;;  %v388_v15 = vld [vmem:[%s2772_s21 + $0x10] sm:$0xff]  ;;  %v387_v16 = vld [vmem:[%s2772_s21 + $0x8] sm:$0xff]  ;;  %v386_v17 = vld [vmem:[%s2772_s21] sm:$0xff]  ;;  %s3137_s13 = sld [smem:[#allocation14_spill]] }
  0x53   :  { %2375 = vmatprep.subr.mxu0 %v174_v3  ;;  %2386 = vmatpush3.msra.mxu1 %v276_v8  ;;  %v2157_v18 = vld [vmem:[%s2767_s17] ss:$0 sm:$0xff]  ;;  %v608_v31 = vld [vmem:[%s2792_s8 + $0x18] sm:$0xff]  ;;  %v607_v32 = vld [vmem:[%s2792_s8 + $0x10] sm:$0xff]  ;;  %s3138_s17 = sld [smem:[#allocation11_spill]] }
  0x54   :  { %2376 = vmatpush3.msra.mxu0 %v174_v3  ;;  %2387 = vmatprep.subr.mxu1 %v275_v9  ;;  %v2162_v34 = vld [vmem:[%s2777_s25] ss:$0 sm:$0xff]  ;;  %v606_v56 = vld [vmem:[%s2792_s8 + $0x8] sm:$0xff]  ;;  %v720_v62 = vld [vmem:[%s2802_s19 + $0x18] sm:$0xff]  ;;  %s3139_s21 = sld [smem:[#allocation12_spill]] }
  0x55   :  { %2377 = vmatprep.subr.mxu0 %v173_v4  ;;  %2388 = vmatpush3.msra.mxu1 %v275_v9  ;;  %v2167_v44 = vld [vmem:[%s2782_s29] ss:$0 sm:$0xff]  ;;  %v719_v63 = vld [vmem:[%s2802_s19 + $0x10] sm:$0xff]  ;;  %v718_v0 = vld [vmem:[%s2802_s19 + $0x8] sm:$0xff]  ;;  %s3140_s25 = sld [smem:[#allocation13_spill]] }
  0x56   :  { %2378 = vmatpush3.msra.mxu0 %v173_v4  ;;  %2395 = vmatprep.subr.mxu1 %v389_v14  ;;  %v2168_v48 = vld [vmem:[%s2787_s3] ss:$0 sm:$0xff]  ;;  %s3141_s29 = sld [smem:[#allocation16_spill]] }
  0x57   :  { %2380 = vmatmul.mubr.msk.f32.vlgmr.msra.gmra.mxu0 %vm177_vm0, %v2948_v5  ;;  %v605_v57 = vld [vmem:[%s2792_s8] sm:$0xff]  ;;  %s3142_s3 = sld [smem:[#allocation15_spill]] }
  0x58   :  { %2382 = vmatprep.mubr.msk.f32.mxu0 %vm177_vm0, %v2950_v6  ;;  %v717_v1 = vld [vmem:[%s2802_s19] sm:$0xff]  ;;  %s3143_s8 = sld [smem:[#allocation20_spill]] }
  0x59   :  { %v2173_v3 = vld [vmem:[%s2797_s14] ss:$0 sm:$0xff]  ;;  %s3144_s14 = sld [smem:[#allocation17_spill]] }
  0x5a   :  { %s3145_s19 = sld [smem:[#allocation18_spill]] }
  0x5b   :  { %2383 = vmatmul.mubr.msk.f32.gmra.mxu0 %vm177_vm0, %v2956_v7  ;;  %s3149_s18 = sld [smem:[#allocation27_spill]] }
  0x5c   :  { %2417 = vmatprep.mubr.msk.f32.mxu0 %vm177_vm0, %v2942_v2  ;;  %s3150_s22 = sld [smem:[#allocation23_spill]] }
  0x5d   :  { %s3151_s23 = sld [smem:[#allocation24_spill]] }
  0x5e   :  { %s3152_s26 = sld [smem:[#allocation25_spill]] }
  0x5f   :  { %s3153_s28 = sld [smem:[#allocation26_spill]] }
 0x117   :  { %v2381_v10 = vpop.f32.mrf.mxu0 }
 0x119   :  { %v256_v11 = vpop.f32.mrf.mxu0 }
 0x11a   :  { %2389 = vmatprep.mubr.msk.f32.mxu1 %vm284_vm1, %v256_v11 }
 0x11b   :  { %v2384_v12 = vpop.f32.mrf.mxu0  ;;  %2390 = vmatmul.mubr.msk.f32.vlgmr.msra.gmra.mxu1 %vm284_vm1, %v2381_v10 }
 0x11c   :  { %2396 = vmatpush3.msra.mxu1 %v389_v14 }
 0x11d   :  { %v266_v13 = vpop.f32.mrf.mxu0  ;;  %2397 = vmatprep.subr.mxu1 %v388_v15 }
 0x11e   :  { %2392 = vmatprep.mubr.msk.f32.mxu1 %vm284_vm1, %v266_v13  ;;  %2398 = vmatpush3.msra.mxu1 %v388_v15 }
 0x11f   :  { %2393 = vmatmul.mubr.msk.f32.gmra.mxu1 %vm284_vm1, %v2384_v12  ;;  %2399 = vmatprep.subr.mxu1 %v387_v16 }
 0x120   :  { %2400 = vmatpush3.msra.mxu1 %v387_v16 }
 0x121   :  { %2401 = vmatprep.subr.mxu1 %v386_v17 }
 0x122   :  { %2402 = vmatpush3.msra.mxu1 %v386_v17 }
 0x123   :  { %2423 = vmatprep.subr.mxu1 %v608_v31 }
 0x1db   :  { %v2391_v19 = vpop.f32.mrf.mxu1 }
 0x1dc   :  { %v369_v20 = vadd.f32 %v2391_v19, %v2157_v18  ;;  %v939_v19 = vld [vmem:[%s2822_s12 + $0x18] sm:$0xff] }
 0x1dd   :  { %v363_v21 = vpop.f32.mrf.mxu1 }
 0x1de   :  { %v364_v22 = vadd.f32 %v2157_v18, %v363_v21  ;;  %v383_v25 = vmax.f32 %v369_v20, 0.0  ;;  %v938_v20 = vld [vmem:[%s2822_s12 + $0x10] sm:$0xff] }
 0x1df   :  { %v2394_v23 = vpop.f32.mrf.mxu1 }
 0x1e0   :  { %v382_v24 = vmax.f32 %v364_v22, 0.0  ;;  %v379_v26 = vadd.f32 %v2394_v23, %v2157_v18  ;;  %v2178_v22 = vld [vmem:[%s2807_s24] ss:$0 sm:$0xff]  ;;  %s3146_s24 = sld [smem:[#allocation19_spill]] }
 0x1e1   :  { %v373_v27 = vpop.f32.mrf.mxu1 }
 0x1e2   :  { %v374_v28 = vadd.f32 %v2157_v18, %v373_v27  ;;  %2403 = vmatprep.mubr.msk.f32.mxu1 %vm177_vm0, %v382_v24  ;;  %v385_v30 = vmax.f32 %v379_v26, 0.0 }
 0x1e3   :  { %2404 = vmatmul.mubr.msk.f32.vlgmr.msra.gmra.mxu1 %vm177_vm0, %v383_v25 }
 0x1e4   :  { %v384_v29 = vmax.f32 %v374_v28, 0.0  ;;  %2424 = vmatpush3.msra.mxu1 %v608_v31 }
 0x1e5   :  { %2425 = vmatprep.subr.mxu1 %v607_v32 }
 0x1e6   :  { %2406 = vmatprep.mubr.msk.f32.mxu1 %vm177_vm0, %v384_v29  ;;  %2426 = vmatpush3.msra.mxu1 %v607_v32  ;;  %v2183_v32 = vld [vmem:[%s2812_s30] ss:$0 sm:$0xff]  ;;  %s3147_s30 = sld [smem:[#allocation22_spill]] }
 0x1e7   :  { %2407 = vmatmul.mubr.msk.f32.gmra.mxu1 %vm177_vm0, %v385_v30  ;;  %2427 = vmatprep.subr.mxu1 %v606_v56 }
 0x1e8   :  { %2428 = vmatpush3.msra.mxu1 %v606_v56 }
 0x1e9   :  { %2429 = vmatprep.subr.mxu1 %v605_v57 }
 0x1ea   :  { %2430 = vmatpush3.msra.mxu1 %v605_v57 }
 0x2a3   :  { %v2405_v33 = vpop.f32.mrf.mxu1 }
 0x2a4   :  { %v481_v36 = vadd.f32 %v2405_v33, %v2162_v34 }
 0x2a5   :  { %v475_v35 = vpop.f32.mrf.mxu1 }
 0x2a6   :  { %v476_v38 = vadd.f32 %v2162_v34, %v475_v35  ;;  %v495_v41 = vmax.f32 %v481_v36, 0.0  ;;  %v2184_v36 = vld [vmem:[%s3134_s0] ss:$0 sm:$0xff] }
 0x2a7   :  { %v2408_v37 = vpop.f32.mrf.mxu1 }
 0x2a8   :  { %v491_v39 = vadd.f32 %v2408_v37, %v2162_v34  ;;  %v494_v45 = vmax.f32 %v476_v38, 0.0  ;;  %v506_v49 = vmul.f32 %v2167_v44, %v495_v41 }
 0x2a9   :  { %v485_v40 = vpop.f32.mrf.mxu1 }
 0x2aa   :  { %v497_v42 = vmax.f32 %v491_v39, 0.0  ;;  %v486_v43 = vadd.f32 %v2162_v34, %v485_v40  ;;  %v505_v52 = vmul.f32 %v2167_v44, %v494_v45  ;;  %v517_v54 = vadd.f32 %v2168_v48, %v506_v49  ;;  %v936_v45 = vld [vmem:[%s2822_s12] sm:$0xff] }
 0x2ac   :  { %v508_v46 = vmul.f32 %v2167_v44, %v497_v42  ;;  %v496_v47 = vmax.f32 %v486_v43, 0.0  ;;  %v516_v55 = vadd.f32 %v2168_v48, %v505_v52  ;;  %v1049_v52 = vld [vmem:[%s3135_s5 + $0x8] sm:$0xff] }
 0x2ae   :  { %v507_v50 = vmul.f32 %v2167_v44, %v496_v47  ;;  %v519_v51 = vadd.f32 %v2168_v48, %v508_v46  ;;  %v937_v44 = vld [vmem:[%s2822_s12 + $0x8] sm:$0xff]  ;;  %s3148_s12 = sld [smem:[#allocation21_spill]] }
 0x2b0   :  { %2409 = vmatprep.subr.mxu0 %v519_v51  ;;  %v518_v53 = vadd.f32 %v2168_v48, %v507_v50  ;;  %v1051_v50 = vld [vmem:[%s3135_s5 + $0x18] sm:$0xff] }
 0x2b1   :  { %2410 = vmatpush3.msra.mxu0 %v519_v51  ;;  %v1050_v51 = vld [vmem:[%s3135_s5 + $0x10] sm:$0xff] }
 0x2b2   :  { %2411 = vmatprep.subr.mxu0 %v518_v53 }
 0x2b3   :  { %2412 = vmatpush3.msra.mxu0 %v518_v53  ;;  %v1048_v53 = vld [vmem:[%s3135_s5] sm:$0xff] }
 0x2b4   :  { %2413 = vmatprep.subr.mxu0 %v517_v54 }
 0x2b5   :  { %2414 = vmatpush3.msra.mxu0 %v517_v54  ;;  %v2189_v54 = vld [vmem:[%s3136_s9] ss:$0 sm:$0xff] }
 0x2b6   :  { %2415 = vmatprep.subr.mxu0 %v516_v55 }
 0x2b7   :  { %2416 = vmatpush3.msra.mxu0 %v516_v55 }
 0x2b8   :  { %2418 = vmatmul.mubr.msk.f32.vlgmr.msra.gmra.mxu0 %vm177_vm0, %v2948_v5  ;;  %2437 = vmatprep.subr.mxu0 %v720_v62 }
 0x2b9   :  { %2420 = vmatprep.mubr.msk.f32.mxu0 %vm177_vm0, %v2950_v6  ;;  %2438 = vmatpush3.msra.mxu0 %v720_v62 }
 0x2ba   :  { %2439 = vmatprep.subr.mxu0 %v719_v63 }
 0x2bb   :  { %2440 = vmatpush3.msra.mxu0 %v719_v63 }
 0x2bc   :  { %2421 = vmatmul.mubr.msk.f32.gmra.mxu0 %vm177_vm0, %v2956_v7  ;;  %2441 = vmatprep.subr.mxu0 %v718_v0 }
 0x2bd   :  { %2442 = vmatpush3.msra.mxu0 %v718_v0 }
 0x2be   :  { %2443 = vmatprep.subr.mxu0 %v717_v1 }
 0x2bf   :  { %2444 = vmatpush3.msra.mxu0 %v717_v1 }
 0x2c0   :  { %2465 = vmatprep.subr.mxu0 %v939_v19 }
 0x378   :  { %v2419_v58 = vpop.f32.mrf.mxu0 }
 0x37a   :  { %v586_v59 = vpop.f32.mrf.mxu0 }
 0x37b   :  { %2431 = vmatprep.mubr.msk.f32.mxu1 %vm177_vm0, %v586_v59 }
 0x37c   :  { %v2422_v60 = vpop.f32.mrf.mxu0  ;;  %2432 = vmatmul.mubr.msk.f32.vlgmr.msra.gmra.mxu1 %vm177_vm0, %v2419_v58 }
 0x37e   :  { %v596_v61 = vpop.f32.mrf.mxu0 }
 0x37f   :  { %2434 = vmatprep.mubr.msk.f32.mxu1 %vm177_vm0, %v596_v61 }
 0x380   :  { %2435 = vmatmul.mubr.msk.f32.gmra.mxu1 %vm177_vm0, %v2422_v60 }
 0x381   :  { %2459 = vmatprep.mubr.msk.f32.mxu1 %vm177_vm0, %v2942_v2 }
 0x43c   :  { %v2433_v4 = vpop.f32.mrf.mxu1 }
 0x43d   :  { %v700_v8 = vadd.f32 %v2433_v4, %v2173_v3  ;;  %v1270_v4 = vld [vmem:[%s3137_s13 + $0x18] sm:$0xff] }
 0x43e   :  { %v694_v9 = vpop.f32.mrf.mxu1 }
 0x43f   :  { %v695_v10 = vadd.f32 %v2173_v3, %v694_v9  ;;  %v714_v13 = vmax.f32 %v700_v8, 0.0  ;;  %v1269_v8 = vld [vmem:[%s3137_s13 + $0x10] sm:$0xff] }
 0x440   :  { %v2436_v11 = vpop.f32.mrf.mxu1 }
 0x441   :  { %v713_v12 = vmax.f32 %v695_v10, 0.0  ;;  %v710_v14 = vadd.f32 %v2436_v11, %v2173_v3  ;;  %v2194_v10 = vld [vmem:[%s3138_s17] ss:$0 sm:$0xff] }
 0x442   :  { %v704_v15 = vpop.f32.mrf.mxu1 }
 0x443   :  { %v705_v16 = vadd.f32 %v2173_v3, %v704_v15  ;;  %2445 = vmatprep.mubr.msk.f32.mxu0 %vm177_vm0, %v713_v12  ;;  %v716_v18 = vmax.f32 %v710_v14, 0.0 }
 0x444   :  { %2446 = vmatmul.mubr.msk.f32.vlgmr.msra.gmra.mxu0 %vm177_vm0, %v714_v13 }
 0x445   :  { %v715_v17 = vmax.f32 %v705_v16, 0.0  ;;  %2466 = vmatpush3.msra.mxu0 %v939_v19 }
 0x446   :  { %2467 = vmatprep.subr.mxu0 %v938_v20 }
 0x447   :  { %2448 = vmatprep.mubr.msk.f32.mxu0 %vm177_vm0, %v715_v17  ;;  %2468 = vmatpush3.msra.mxu0 %v938_v20  ;;  %v2199_v20 = vld [vmem:[%s3139_s21] ss:$0 sm:$0xff] }
 0x448   :  { %2449 = vmatmul.mubr.msk.f32.gmra.mxu0 %vm177_vm0, %v716_v18  ;;  %2469 = vmatprep.subr.mxu0 %v937_v44 }
 0x449   :  { %2470 = vmatpush3.msra.mxu0 %v937_v44 }
 0x44a   :  { %2471 = vmatprep.subr.mxu0 %v936_v45 }
 0x44b   :  { %2472 = vmatpush3.msra.mxu0 %v936_v45 }
 0x504   :  { %v2447_v21 = vpop.f32.mrf.mxu0 }
 0x505   :  { %v812_v24 = vadd.f32 %v2447_v21, %v2178_v22 }
 0x506   :  { %v806_v23 = vpop.f32.mrf.mxu0 }
 0x507   :  { %v807_v26 = vadd.f32 %v2178_v22, %v806_v23  ;;  %v826_v29 = vmax.f32 %v812_v24, 0.0  ;;  %v2200_v24 = vld [vmem:[%s3140_s25] ss:$0 sm:$0xff] }
 0x508   :  { %v2450_v25 = vpop.f32.mrf.mxu0 }
 0x509   :  { %v822_v27 = vadd.f32 %v2450_v25, %v2178_v22  ;;  %v825_v33 = vmax.f32 %v807_v26, 0.0  ;;  %v837_v37 = vmul.f32 %v2183_v32, %v826_v29 }
 0x50a   :  { %v816_v28 = vpop.f32.mrf.mxu0 }
 0x50b   :  { %v828_v30 = vmax.f32 %v822_v27, 0.0  ;;  %v817_v31 = vadd.f32 %v2178_v22, %v816_v28  ;;  %v836_v40 = vmul.f32 %v2183_v32, %v825_v33  ;;  %v848_v42 = vadd.f32 %v2184_v36, %v837_v37  ;;  %v1267_v33 = vld [vmem:[%s3137_s13] sm:$0xff] }
 0x50d   :  { %v839_v34 = vmul.f32 %v2183_v32, %v828_v30  ;;  %v827_v35 = vmax.f32 %v817_v31, 0.0  ;;  %v847_v43 = vadd.f32 %v2184_v36, %v836_v40  ;;  %v1380_v40 = vld [vmem:[%s3141_s29 + $0x8] sm:$0xff] }
 0x50f   :  { %v838_v38 = vmul.f32 %v2183_v32, %v827_v35  ;;  %v850_v39 = vadd.f32 %v2184_v36, %v839_v34  ;;  %v1268_v32 = vld [vmem:[%s3137_s13 + $0x8] sm:$0xff] }
 0x511   :  { %2451 = vmatprep.subr.mxu1 %v850_v39  ;;  %v849_v41 = vadd.f32 %v2184_v36, %v838_v38  ;;  %v1382_v38 = vld [vmem:[%s3141_s29 + $0x18] sm:$0xff] }
 0x512   :  { %2452 = vmatpush3.msra.mxu1 %v850_v39  ;;  %v1381_v39 = vld [vmem:[%s3141_s29 + $0x10] sm:$0xff] }
 0x513   :  { %2453 = vmatprep.subr.mxu1 %v849_v41 }
 0x514   :  { %2454 = vmatpush3.msra.mxu1 %v849_v41  ;;  %v1379_v41 = vld [vmem:[%s3141_s29] sm:$0xff] }
 0x515   :  { %2455 = vmatprep.subr.mxu1 %v848_v42 }
 0x516   :  { %2456 = vmatpush3.msra.mxu1 %v848_v42  ;;  %v2205_v42 = vld [vmem:[%s3142_s3] ss:$0 sm:$0xff] }
 0x517   :  { %2457 = vmatprep.subr.mxu1 %v847_v43 }
 0x518   :  { %2458 = vmatpush3.msra.mxu1 %v847_v43 }
 0x519   :  { %2460 = vmatmul.mubr.msk.f32.vlgmr.msra.gmra.mxu1 %vm177_vm0, %v2948_v5  ;;  %2479 = vmatprep.subr.mxu1 %v1051_v50 }
 0x51a   :  { %2462 = vmatprep.mubr.msk.f32.mxu1 %vm177_vm0, %v2950_v6  ;;  %2480 = vmatpush3.msra.mxu1 %v1051_v50 }
 0x51b   :  { %2481 = vmatprep.subr.mxu1 %v1050_v51 }
 0x51c   :  { %2482 = vmatpush3.msra.mxu1 %v1050_v51 }
 0x51d   :  { %2463 = vmatmul.mubr.msk.f32.gmra.mxu1 %vm177_vm0, %v2956_v7  ;;  %2483 = vmatprep.subr.mxu1 %v1049_v52 }
 0x51e   :  { %2484 = vmatpush3.msra.mxu1 %v1049_v52 }
 0x51f   :  { %2485 = vmatprep.subr.mxu1 %v1048_v53 }
 0x520   :  { %2486 = vmatpush3.msra.mxu1 %v1048_v53 }
 0x521   :  { %2507 = vmatprep.subr.mxu1 %v1270_v4 }
 0x5d9   :  { %v2461_v46 = vpop.f32.mrf.mxu1 }
 0x5db   :  { %v917_v47 = vpop.f32.mrf.mxu1 }
 0x5dc   :  { %2473 = vmatprep.mubr.msk.f32.mxu0 %vm177_vm0, %v917_v47 }
 0x5dd   :  { %v2464_v48 = vpop.f32.mrf.mxu1  ;;  %2474 = vmatmul.mubr.msk.f32.vlgmr.msra.gmra.mxu0 %vm177_vm0, %v2461_v46 }
 0x5df   :  { %v927_v49 = vpop.f32.mrf.mxu1 }
 0x5e0   :  { %2476 = vmatprep.mubr.msk.f32.mxu0 %vm177_vm0, %v927_v49 }
 0x5e1   :  { %2477 = vmatmul.mubr.msk.f32.gmra.mxu0 %vm177_vm0, %v2464_v48 }
 0x5e2   :  { %2501 = vmatprep.mubr.msk.f32.mxu0 %vm177_vm0, %v2942_v2 }
 0x69d   :  { %v2475_v55 = vpop.f32.mrf.mxu0 }
 0x69e   :  { %v1031_v56 = vadd.f32 %v2475_v55, %v2189_v54  ;;  %v1600_v55 = vld [vmem:[%s3143_s8 + $0x10] sm:$0xff] }
 0x69f   :  { %v1025_v57 = vpop.f32.mrf.mxu0 }
 0x6a0   :  { %v1026_v58 = vadd.f32 %v2189_v54, %v1025_v57  ;;  %v1045_v61 = vmax.f32 %v1031_v56, 0.0  ;;  %v2210_v57 = vld [vmem:[%s3144_s14] ss:$0 sm:$0xff] }
 0x6a1   :  { %v2478_v59 = vpop.f32.mrf.mxu0 }
 0x6a2   :  { %v1044_v60 = vmax.f32 %v1026_v58, 0.0  ;;  %v1041_v62 = vadd.f32 %v2478_v59, %v2189_v54 }
 0x6a3   :  { %v1035_v63 = vpop.f32.mrf.mxu0 }
 0x6a4   :  { %v1036_v0 = vadd.f32 %v2189_v54, %v1035_v63  ;;  %2487 = vmatprep.mubr.msk.f32.mxu1 %vm177_vm0, %v1044_v60  ;;  %v1047_v3 = vmax.f32 %v1041_v62, 0.0  ;;  %v1601_v54 = vld [vmem:[%s3143_s8 + $0x18] sm:$0xff] }
 0x6a5   :  { %2488 = vmatmul.mubr.msk.f32.vlgmr.msra.gmra.mxu1 %vm177_vm0, %v1045_v61 }
 0x6a6   :  { %v1046_v1 = vmax.f32 %v1036_v0, 0.0  ;;  %2508 = vmatpush3.msra.mxu1 %v1270_v4  ;;  %v2215_v4 = vld [vmem:[%s3145_s19] ss:$0 sm:$0xff] }
 0x6a7   :  { %2509 = vmatprep.subr.mxu1 %v1269_v8 }
 0x6a8   :  { %2490 = vmatprep.mubr.msk.f32.mxu1 %vm177_vm0, %v1046_v1  ;;  %2510 = vmatpush3.msra.mxu1 %v1269_v8 }
 0x6a9   :  { %2491 = vmatmul.mubr.msk.f32.gmra.mxu1 %vm177_vm0, %v1047_v3  ;;  %2511 = vmatprep.subr.mxu1 %v1268_v32 }
 0x6aa   :  { %2512 = vmatpush3.msra.mxu1 %v1268_v32 }
 0x6ab   :  { %2513 = vmatprep.subr.mxu1 %v1267_v33 }
 0x6ac   :  { %2514 = vmatpush3.msra.mxu1 %v1267_v33 }
 0x765   :  { %v2489_v9 = vpop.f32.mrf.mxu1 }
 0x766   :  { %v1143_v12 = vadd.f32 %v2489_v9, %v2194_v10 }
 0x767   :  { %v1137_v11 = vpop.f32.mrf.mxu1 }
 0x768   :  { %v1138_v14 = vadd.f32 %v2194_v10, %v1137_v11  ;;  %v1157_v17 = vmax.f32 %v1143_v12, 0.0  ;;  %v2216_v11 = vld [vmem:[%s3146_s24] ss:$0 sm:$0xff] }
 0x769   :  { %v2492_v13 = vpop.f32.mrf.mxu1 }
 0x76a   :  { %v1153_v15 = vadd.f32 %v2492_v13, %v2194_v10  ;;  %v1156_v21 = vmax.f32 %v1138_v14, 0.0  ;;  %v1168_v25 = vmul.f32 %v2199_v20, %v1157_v17 }
 0x76b   :  { %v1147_v16 = vpop.f32.mrf.mxu1 }
 0x76c   :  { %v1159_v18 = vmax.f32 %v1153_v15, 0.0  ;;  %v1148_v19 = vadd.f32 %v2194_v10, %v1147_v16  ;;  %v1167_v28 = vmul.f32 %v2199_v20, %v1156_v21  ;;  %v1179_v30 = vadd.f32 %v2200_v24, %v1168_v25  ;;  %v1710_v25 = vld [vmem:[%s3147_s30] sm:$0xff] }
 0x76e   :  { %v1170_v22 = vmul.f32 %v2199_v20, %v1159_v18  ;;  %v1158_v23 = vmax.f32 %v1148_v19, 0.0  ;;  %v1178_v31 = vadd.f32 %v2200_v24, %v1167_v28  ;;  %v1599_v19 = vld [vmem:[%s3143_s8 + $0x8] sm:$0xff] }
 0x770   :  { %v1169_v26 = vmul.f32 %v2199_v20, %v1158_v23  ;;  %v1181_v27 = vadd.f32 %v2200_v24, %v1170_v22  ;;  %v1598_v20 = vld [vmem:[%s3143_s8] sm:$0xff]  ;;  %v1712_v23 = vld [vmem:[%s3147_s30 + $0x10] sm:$0xff] }
 0x772   :  { %2493 = vmatprep.subr.mxu0 %v1181_v27  ;;  %v1180_v29 = vadd.f32 %v2200_v24, %v1169_v26  ;;  %v1711_v24 = vld [vmem:[%s3147_s30 + $0x8] sm:$0xff]  ;;  %v2221_v26 = vld [vmem:[%s3148_s12] ss:$0 sm:$0xff] }
 0x773   :  { %2494 = vmatpush3.msra.mxu0 %v1181_v27 }
 0x774   :  { %2495 = vmatprep.subr.mxu0 %v1180_v29 }
 0x775   :  { %2496 = vmatpush3.msra.mxu0 %v1180_v29 }
 0x776   :  { %2497 = vmatprep.subr.mxu0 %v1179_v30 }
 0x777   :  { %2498 = vmatpush3.msra.mxu0 %v1179_v30 }
 0x778   :  { %2499 = vmatprep.subr.mxu0 %v1178_v31 }
 0x779   :  { %2500 = vmatpush3.msra.mxu0 %v1178_v31 }
 0x77a   :  { %2502 = vmatmul.mubr.msk.f32.vlgmr.msra.gmra.mxu0 %vm177_vm0, %v2948_v5  ;;  %2521 = vmatprep.subr.mxu0 %v1382_v38 }
 0x77b   :  { %2504 = vmatprep.mubr.msk.f32.mxu0 %vm177_vm0, %v2950_v6  ;;  %2522 = vmatpush3.msra.mxu0 %v1382_v38 }
 0x77c   :  { %2523 = vmatprep.subr.mxu0 %v1381_v39 }
 0x77d   :  { %2524 = vmatpush3.msra.mxu0 %v1381_v39  ;;  %v2741_v39 = vmov 0.0  }
 0x77e   :  { %2505 = vmatmul.mubr.msk.f32.gmra.mxu0 %vm177_vm0, %v2956_v7  ;;  %2525 = vmatprep.subr.mxu0 %v1380_v40 }
 0x77f   :  { %2526 = vmatpush3.msra.mxu0 %v1380_v40  ;;  %v1921_v40 = vld [vmem:[%s3149_s18 + $0x18] sm:$0xff] }
 0x780   :  { %2527 = vmatprep.subr.mxu0 %v1379_v41 }
 0x781   :  { %2528 = vmatpush3.msra.mxu0 %v1379_v41  ;;  %v1920_v41 = vld [vmem:[%s3149_s18 + $0x10] sm:$0xff] }
 0x782   :  { %2549 = vmatprep.subr.mxu0 %v1601_v54 }
 0x83a   :  { %v2503_v34 = vpop.f32.mrf.mxu0 }
 0x83c   :  { %v1248_v35 = vpop.f32.mrf.mxu0 }
 0x83d   :  { %2515 = vmatprep.mubr.msk.f32.mxu1 %vm177_vm0, %v1248_v35 }
 0x83e   :  { %v2506_v36 = vpop.f32.mrf.mxu0  ;;  %2516 = vmatmul.mubr.msk.f32.vlgmr.msra.gmra.mxu1 %vm177_vm0, %v2503_v34 }
 0x840   :  { %v1258_v37 = vpop.f32.mrf.mxu0 }
 0x841   :  { %2518 = vmatprep.mubr.msk.f32.mxu1 %vm177_vm0, %v1258_v37 }
 0x842   :  { %2519 = vmatmul.mubr.msk.f32.gmra.mxu1 %vm177_vm0, %v2506_v36 }
 0x843   :  { %2543 = vmatprep.mubr.msk.f32.mxu1 %vm177_vm0, %v2942_v2 }
 0x8fe   :  { %v2517_v43 = vpop.f32.mrf.mxu1 }
 0x8ff   :  { %v1362_v44 = vadd.f32 %v2517_v43, %v2205_v42 }
 0x900   :  { %v1356_v45 = vpop.f32.mrf.mxu1 }
 0x901   :  { %v1357_v46 = vadd.f32 %v2205_v42, %v1356_v45  ;;  %v1376_v48 = vmax.f32 %v1362_v44, 0.0  ;;  %v2226_v44 = vld [vmem:[%s3150_s22] ss:$0 sm:$0xff] }
 0x902   :  { %v2520_v2 = vpop.f32.mrf.mxu1 }
 0x903   :  { %v1375_v47 = vmax.f32 %v1357_v46, 0.0  ;;  %v1372_v49 = vadd.f32 %v2520_v2, %v2205_v42 }
 0x904   :  { %v1366_v50 = vpop.f32.mrf.mxu1 }
 0x905   :  { %v1367_v51 = vadd.f32 %v2205_v42, %v1366_v50  ;;  %2529 = vmatprep.mubr.msk.f32.mxu0 %vm177_vm0, %v1375_v47  ;;  %v1378_v53 = vmax.f32 %v1372_v49, 0.0  ;;  %v1919_v42 = vld [vmem:[%s3149_s18 + $0x8] sm:$0xff] }
 0x906   :  { %2530 = vmatmul.mubr.msk.f32.vlgmr.msra.gmra.mxu0 %vm177_vm0, %v1376_v48 }
 0x907   :  { %v1377_v52 = vmax.f32 %v1367_v51, 0.0  ;;  %2550 = vmatpush3.msra.mxu0 %v1601_v54 }
 0x908   :  { %2551 = vmatprep.subr.mxu0 %v1600_v55 }
 0x909   :  { %2532 = vmatprep.mubr.msk.f32.mxu0 %vm177_vm0, %v1377_v52  ;;  %2552 = vmatpush3.msra.mxu0 %v1600_v55 }
 0x90a   :  { %2533 = vmatmul.mubr.msk.f32.gmra.mxu0 %vm177_vm0, %v1378_v53  ;;  %2553 = vmatprep.subr.mxu0 %v1599_v19  ;;  %v2231_v53 = vld [vmem:[%s3151_s23] ss:$0 sm:$0xff] }
 0x90b   :  { %2554 = vmatpush3.msra.mxu0 %v1599_v19 }
 0x90c   :  { %2555 = vmatprep.subr.mxu0 %v1598_v20 }
 0x90d   :  { %2556 = vmatpush3.msra.mxu0 %v1598_v20 }
 0x90e   :  { %2577 = vmatprep.subr.mxu0 %v2741_v39 }
 0x9c6   :  { %v2531_v56 = vpop.f32.mrf.mxu0 }
 0x9c7   :  { %v1474_v59 = vadd.f32 %v2531_v56, %v2210_v57 }
 0x9c8   :  { %v1468_v58 = vpop.f32.mrf.mxu0 }
 0x9c9   :  { %v1469_v61 = vadd.f32 %v2210_v57, %v1468_v58  ;;  %v1488_v0 = vmax.f32 %v1474_v59, 0.0 }
 0x9ca   :  { %v2534_v60 = vpop.f32.mrf.mxu0 }
 0x9cb   :  { %v1484_v62 = vadd.f32 %v2534_v60, %v2210_v57  ;;  %v1487_v8 = vmax.f32 %v1469_v61, 0.0  ;;  %v1499_v12 = vmul.f32 %v2215_v4, %v1488_v0 }
 0x9cc   :  { %v1478_v63 = vpop.f32.mrf.mxu0 }
 0x9cd   :  { %v1490_v1 = vmax.f32 %v1484_v62, 0.0  ;;  %v1479_v3 = vadd.f32 %v2210_v57, %v1478_v63  ;;  %v1498_v15 = vmul.f32 %v2215_v4, %v1487_v8  ;;  %v1510_v17 = vadd.f32 %v2216_v11, %v1499_v12  ;;  %v2232_v57 = vld [vmem:[%s3152_s26] ss:$0 sm:$0xff] }
 0x9ce   :  { %v2003_v12 = vld [vmem:[%s2927_s20] sm:$0xff] }
 0x9cf   :  { %v1501_v9 = vmul.f32 %v2215_v4, %v1490_v1  ;;  %v1489_v10 = vmax.f32 %v1479_v3, 0.0  ;;  %v1509_v18 = vadd.f32 %v2216_v11, %v1498_v15  ;;  %v1844_v1 = vld [vmem:[%s3153_s28] sm:$0x3] }
 0x9d0   :  { %v1918_v3 = vld [vmem:[%s3149_s18] sm:$0xff] }
 0x9d1   :  { %v1500_v13 = vmul.f32 %v2215_v4, %v1489_v10  ;;  %v1512_v14 = vadd.f32 %v2216_v11, %v1501_v9  ;;  %v2006_v4 = vld [vmem:[%s2927_s20 + $0x18] sm:$0xff]  ;;  %v2005_v10 = vld [vmem:[%s2927_s20 + $0x10] sm:$0xff] }
 0x9d3   :  { %2535 = vmatprep.subr.mxu1 %v1512_v14  ;;  %v1511_v16 = vadd.f32 %v2216_v11, %v1500_v13  ;;  %v2004_v11 = vld [vmem:[%s2927_s20 + $0x8] sm:$0xff]  ;;  %v2234_v13 = vld [vmem:[%s2922_s6] ss:$0 sm:$0xff]  ;;  %s2743_s6 = smov [#allocation5]  }
 0x9d4   :  { %2536 = vmatpush3.msra.mxu1 %v1512_v14  ;;  %s2107_s20 = sshll.u32 %s2743_s6, 4  ;;  %s2108_s20 = int_to_ptr.vmem [resolvable:$true] %s2107_s20 }
 0x9d5   :  { %2537 = vmatprep.subr.mxu1 %v1511_v16  ;;  %p2682_p6 = scmp.lt.s32.totalorder %s2108_s20, %s2108_s20 }
 0x9d6   :  { %2538 = vmatpush3.msra.mxu1 %v1511_v16 }
 0x9d7   :  { %2539 = vmatprep.subr.mxu1 %v1510_v17 }
 0x9d8   :  { %2540 = vmatpush3.msra.mxu1 %v1510_v17 }
 0x9d9   :  { %2541 = vmatprep.subr.mxu1 %v1509_v18 }
 0x9da   :  { %2542 = vmatpush3.msra.mxu1 %v1509_v18  ;;  %v2236_v18 = vld [vmem:[%s2932_s27] ss:$0 sm:$0xff]  ;;  %s2677_s27 = scalar_lea.vmem %s2108_s20, 32 }
 0x9db   :  { %2544 = vmatmul.mubr.msk.f32.vlgmr.msra.gmra.mxu1 %vm177_vm0, %v2948_v5  ;;  %p2678_p5 = scmp.ne.s32.totalorder %s2108_s20, %s2677_s27  ;;  %p2683_p7 = scmp.lt.s32.totalorder %s2677_s27, %s2677_s27 }
 0x9dc   :  { %2546 = vmatprep.mubr.msk.f32.mxu1 %vm177_vm0, %v2950_v6 }
 0x9dd   :  { %p2684_p8 = por %p2683_p7, %p2682_p6 }
 0x9df   :  { %2547 = vmatmul.mubr.msk.f32.gmra.mxu1 %vm177_vm0, %v2956_v7  ;;  %v1713_v7 = vld [vmem:[%s3147_s30 + $0x18] sm:$0xff]  ;;  %p2685_p9 = pnand %p2684_p8, %p2678_p5 }
 0x9e0   :  { %2563 = vmatprep.subr.mxu1 %v1713_v7 }
 0x9e1   :  { %2564 = vmatpush3.msra.mxu1 %v1713_v7 }
 0x9e2   :  { %2565 = vmatprep.subr.mxu1 %v1712_v23 }
 0x9e3   :  { %2566 = vmatpush3.msra.mxu1 %v1712_v23 }
 0x9e4   :  { %2567 = vmatprep.subr.mxu1 %v1711_v24 }
 0x9e5   :  { %2568 = vmatpush3.msra.mxu1 %v1711_v24 }
 0x9e6   :  { %2569 = vmatprep.subr.mxu1 %v1710_v25 }
 0x9e7   :  { %2570 = vmatpush3.msra.mxu1 %v1710_v25 }
 0x9e8   :  { %2588 = vmatprep.subr.mxu1 %v2741_v39 }
 0xa9b   :  { %v2545_v21 = vpop.f32.mrf.mxu1 }
 0xa9d   :  { %v1579_v22 = vpop.f32.mrf.mxu1 }
 0xa9e   :  { %2557 = vmatprep.mubr.msk.f32.mxu0 %vm177_vm0, %v1579_v22 }
 0xa9f   :  { %v2548_v5 = vpop.f32.mrf.mxu1  ;;  %2558 = vmatmul.mubr.msk.f32.vlgmr.msra.gmra.mxu0 %vm177_vm0, %v2545_v21 }
 0xaa1   :  { %v1589_v6 = vpop.f32.mrf.mxu1 }
 0xaa2   :  { %2560 = vmatprep.mubr.msk.f32.mxu0 %vm177_vm0, %v1589_v6 }
 0xaa3   :  { %2561 = vmatmul.mubr.msk.f32.gmra.mxu0 %vm177_vm0, %v2548_v5 }
 0xaa4   :  { %2585 = vmatprep.mubr.msk.f32.mxu0 %vm2742_vm2, %v2741_v39 }
 0xb5f   :  { %v2559_v27 = vpop.f32.mrf.mxu0 }
 0xb60   :  { %v1693_v28 = vadd.f32 %v2559_v27, %v2221_v26 }
 0xb61   :  { %v1687_v29 = vpop.f32.mrf.mxu0 }
 0xb62   :  { %v1688_v30 = vadd.f32 %v2221_v26, %v1687_v29  ;;  %v1707_v33 = vmax.f32 %v1693_v28, 0.0 }
 0xb63   :  { %v2562_v31 = vpop.f32.mrf.mxu0 }
 0xb64   :  { %v1706_v32 = vmax.f32 %v1688_v30, 0.0  ;;  %v1703_v34 = vadd.f32 %v2562_v31, %v2221_v26 }
 0xb65   :  { %v1697_v35 = vpop.f32.mrf.mxu0 }
 0xb66   :  { %v1698_v36 = vadd.f32 %v2221_v26, %v1697_v35  ;;  %2571 = vmatprep.mubr.msk.f32.mxu1 %vm177_vm0, %v1706_v32  ;;  %v1709_v38 = vmax.f32 %v1703_v34, 0.0 }
 0xb67   :  { %2572 = vmatmul.mubr.msk.f32.vlgmr.msra.gmra.mxu1 %vm177_vm0, %v1707_v33 }
 0xb68   :  { %v1708_v37 = vmax.f32 %v1698_v36, 0.0  ;;  %2589 = vmatpush3.msra.mxu1 %v1921_v40 }
 0xb69   :  { %2590 = vmatprep.subr.mxu1 %v2741_v39 }
 0xb6a   :  { %2574 = vmatprep.mubr.msk.f32.mxu1 %vm177_vm0, %v1708_v37  ;;  %2591 = vmatpush3.msra.mxu1 %v1920_v41 }
 0xb6b   :  { %2575 = vmatmul.mubr.msk.f32.gmra.mxu1 %vm177_vm0, %v1709_v38  ;;  %2592 = vmatprep.subr.mxu1 %v2741_v39 }
 0xb6c   :  { %2596 = vmatprep.mubr.msk.f32.mxu1 %vm2742_vm2, %v2741_v39  ;;  %2593 = vmatpush3.msra.mxu1 %v1919_v42 }
 0xb6d   :  { %2594 = vmatprep.subr.mxu1 %v2741_v39 }
 0xb6e   :  { %2595 = vmatpush3.msra.mxu1 %v1918_v3 }
 0xc27   :  { %v2573_v43 = vpop.f32.mrf.mxu1 }
 0xc28   :  { %v1805_v46 = vadd.f32 %v2573_v43, %v2226_v44 }
 0xc29   :  { %v1799_v45 = vpop.f32.mrf.mxu1 }
 0xc2a   :  { %v1800_v47 = vadd.f32 %v2226_v44, %v1799_v45  ;;  %v1819_v50 = vmax.f32 %v1805_v46, 0.0 }
 0xc2b   :  { %v2576_v2 = vpop.f32.mrf.mxu1 }
 0xc2c   :  { %v1815_v48 = vadd.f32 %v2576_v2, %v2226_v44  ;;  %v1818_v54 = vmax.f32 %v1800_v47, 0.0  ;;  %v1830_v58 = vmul.f32 %v2231_v53, %v1819_v50 }
 0xc2d   :  { %v1809_v49 = vpop.f32.mrf.mxu1 }
 0xc2e   :  { %v1821_v51 = vmax.f32 %v1815_v48, 0.0  ;;  %v1810_v52 = vadd.f32 %v2226_v44, %v1809_v49  ;;  %v1829_v61 = vmul.f32 %v2231_v53, %v1818_v54  ;;  %v1841_v63 = vadd.f32 %v2232_v57, %v1830_v58 }
 0xc30   :  { %v1832_v55 = vmul.f32 %v2231_v53, %v1821_v51  ;;  %v1820_v56 = vmax.f32 %v1810_v52, 0.0  ;;  %v1840_v0 = vadd.f32 %v2232_v57, %v1829_v61 }
 0xc32   :  { %v1843_v59 = vadd.f32 %v2232_v57, %v1832_v55  ;;  %v1831_v60 = vmul.f32 %v2231_v53, %v1820_v56 }
 0xc34   :  { %v1842_v62 = vadd.f32 %v2232_v57, %v1831_v60  ;;  %2578 = vmatpush3.msra.mxu0 %v1843_v59 }
 0xc35   :  { %2579 = vmatprep.subr.mxu0 %v2741_v39 }
 0xc36   :  { %2580 = vmatpush3.msra.mxu0 %v1842_v62 }
 0xc37   :  { %2581 = vmatprep.subr.mxu0 %v2741_v39 }
 0xc38   :  { %2582 = vmatpush3.msra.mxu0 %v1841_v63 }
 0xc39   :  { %2583 = vmatprep.subr.mxu0 %v2741_v39 }
 0xc3a   :  { %2584 = vmatpush3.msra.mxu0 %v1840_v0 }
 0xc3b   :  { %2586 = vmatmul.mubr.msk.f32.vlgmr.msra.gmra.mxu0 %vm177_vm0, %v1844_v1  ;;  %2599 = vmatprep.subr.mxu0 %v2741_v39 }
 0xc3c   :  { %2607 = vmatprep.mubr.msk.f32.mxu0 %vm2742_vm2, %v2741_v39  ;;  %2600 = vmatpush3.msra.mxu0 %v2006_v4 }
 0xc3d   :  { %2601 = vmatprep.subr.mxu0 %v2741_v39 }
 0xc3e   :  { %2602 = vmatpush3.msra.mxu0 %v2005_v10 }
 0xc3f   :  { %2603 = vmatprep.subr.mxu0 %v2741_v39 }
 0xc40   :  { %2604 = vmatpush3.msra.mxu0 %v2004_v11 }
 0xc41   :  { %2605 = vmatprep.subr.mxu0 %v2741_v39 }
 0xc42   :  { %2606 = vmatpush3.msra.mxu0 %v2003_v12 }
 0xcfb   :  { %v1914_v8 = vpop.f32.mrf.mxu0 }
 0xcfc   :  { %2597 = vmatmul.mubr.msk.f32.vlgmr.msra.gmra.mxu1 %vm177_vm0, %v1914_v8 }
 0xcfd   :  { %v2587_v9 = vpop.f32.mrf.mxu0 }
 0xdbc   :  { %v1998_v14 = vpop.f32.mrf.mxu1 }
 0xdbd   :  { %v1999_v15 = vadd.f32 %v2234_v13, %v1998_v14 }
 0xdbe   :  { %v2598_v16 = vpop.f32.mrf.mxu1 }
 0xdbf   :  { %v2002_v17 = vmax.f32 %v1999_v15, 0.0 }
 0xdc1   :  { %2608 = vmatmul.mubr.msk.f32.vlgmr.msra.gmra.mxu0 %vm177_vm0, %v2002_v17 }
 0xe81   :  { %v2083_v19 = vpop.f32.mrf.mxu0 }
 0xe82   :  { %v2084_v20 = vadd.f32 %v2236_v18, %v2083_v19 }
 0xe83   :  { %v2609_v21 = vpop.f32.mrf.mxu0 }
 0xe84   :  { %v2088_v22 = vsel %vm2087_vm3, %v2084_v20, -inf }
 0xe85   :  { %2089 = vmax.xlane.f32.xlu0 %v2088_v22 }
 0xf0e   :  { %v2090_v5 = vpop.xlane.xlu0 %2089 }
 0xf0f   :  { %v2091_v6 = vsub.f32 %v2084_v20, %v2090_v5 }
 0xf11   :  { %v2092_v7 = vmul.f32 1.442695, %v2091_v6 }
 0xf13   :  { %2653 = vpow2.f32 %v2092_v7 }
 0xf20   :  { %v2654_v23 = vpop.eup %2653 }
 0xf21   :  { %v2094_v24 = vsel %vm2087_vm3, %v2654_v23, 0.0 }
 0xf22   :  { %2095 = vadd.xlane.f32.xlu0 %v2094_v24 }
 0xfab   :  { %v2096_v25 = vpop.xlane.xlu0 %2095 }
 0xfac   :  { %2655 = vlog2.f32 %v2096_v25 }
 0xfb9   :  { %v2656_v26 = vpop.eup %2655 }
 0xfba   :  { %v2098_v27 = vmul.f32 0.6931472, %v2656_v26 }
 0xfbc   :  { %v2099_v28 = vsub.f32 %v2091_v6, %v2098_v27 }
 0xfbe   :  { %2100 = vst.msk [vmem:[#allocation5] sm:$0x3] %vm2087_vm3, %v2099_v28 }
 0xfbf   :  { %2688 = shalt.err (!%p2685_p9)
}
 0xfc0   :  { %2110 = dma.vmem_to_hbm [thread:$0]  %s2108_s20, 32, %s2937_s4, [#allocation4]  }
 0xfc1   :  { %2699 = dma.done.wait [#allocation4], 32  }
 0xfc2   :  { %2700 = vsyncadd [#allocation4], 4294967264 }
 0xfc3   :  { %2114 = vsyncpa [#allocation3], 1 }
 0xfc4   :  { %2115 = vsyncpa [#allocation4], 1 }

</bundles_post_ra>
